<compile_context>
chip_gen: v5e
topology: v5e:2x2
jax: 0.10.0
libtpu: 0.0.40
codegen_flags: <defaults>
</compile_context>

<pallas_src>
import functools

import jax
import jax.numpy as jnp
from jax.experimental import pallas as pl
from jax.experimental.pallas import tpu as pltpu


def _rawnet_kernel(x_ref, w1_ref, b1_ref, w2_ref, b2_ref, w3_ref, b3_ref, o_ref,
                   *, act_dtype):
    """One batch tile in feature-major layout.

    x_ref : [2, TN]   input tile (features on sublanes, batch on the 128-lane axis)
    w1_ref: [H, 2]    b1_ref: [H, 1]
    w2_ref: [H, H]    b2_ref: [H, 1]
    w3_ref: [H, 1]    b3_ref: [1]   (SMEM scalar)
    o_ref : [1, TN]   lane-dense output tile
    """
    x0 = x_ref[0:1, :]  # [1, TN]
    x1 = x_ref[1:2, :]  # [1, TN]

    # Layer 1 (K=2): two VPU broadcast-FMAs — a K=2 MXU pass would be pure drain.
    z1 = w1_ref[:, 0:1] * x0 + w1_ref[:, 1:2] * x1 + b1_ref[...]          # [H, TN] f32
    h1 = jnp.tanh(z1.astype(act_dtype))                                   # [H, TN]

    # Layer 2 (H x H): the one real MXU matmul, f32 accumulation.
    z2 = jnp.dot(w2_ref[...].astype(act_dtype), h1,
                 preferred_element_type=jnp.float32) + b2_ref[...]        # [H, TN] f32
    h2 = jnp.tanh(z2.astype(act_dtype)).astype(jnp.float32)               # [H, TN] f32

    # Layer 3 (H -> 1): elementwise multiply + sublane reduce (VPU + XLU), skip the MXU.
    logits = jnp.sum(w3_ref[...] * h2, axis=0, keepdims=True) + b3_ref[0]  # [1, TN]
    o_ref[...] = jax.nn.sigmoid(logits).astype(o_ref.dtype)


def _pick_tile_n(n, tile_n):
    if tile_n is not None:
        return max(512, (tile_n // 512) * 512)
    # >= 4 tiles for mid-size N (>= 2 per TC on v7x megacore, keeps the DMA pipeline
    # alive), capped at 32K lanes so big batches amortize the fixed grid-step cost.
    target = pl.cdiv(n, 4)
    return min(32768, pl.cdiv(max(target, 1), 512) * 512)


def rawnet_forward(x, params, *, tile_n=None, use_bf16_activations=False):
    """x: [N, 2]. params: PyTorch-convention weights. Returns [N, 1].

    use_bf16_activations=True runs tanh / the HxH matmul in bf16 (v6e/v7x only;
    ~1e-3 abs error on the sigmoid output). Default f32 is correct on all chips.
    """
    n = x.shape[0]
    h = params["w1"].shape[0]
    act_dtype = jnp.bfloat16 if use_bf16_activations else jnp.float32

    tile_n = _pick_tile_n(n, tile_n)
    n_pad = pl.cdiv(n, tile_n) * tile_n

    # Feature-major layout: batch lives on the lane (last) axis; pad with jnp.pad
    # (cheaper than zeros().at[].set(): no full zero buffer + scatter pass).
    x_t = x.astype(jnp.float32).T                                  # [2, N]
    if n_pad != n:
        x_t = jnp.pad(x_t, ((0, 0), (0, n_pad - n)))

    # PyTorch (out, in) weights are already the right orientation for W @ x.
    w1 = params["w1"].astype(jnp.float32)                 # [H, 2]
    b1 = params["b1"].astype(jnp.float32)[:, None]        # [H, 1]
    w2 = params["w2"].astype(jnp.float32)                 # [H, H]
    b2 = params["b2"].astype(jnp.float32)[:, None]        # [H, 1]
    w3 = params["w3"].astype(jnp.float32).T               # [H, 1]
    b3 = params["b3"].astype(jnp.float32).reshape((1,))   # [1]  -> SMEM scalar

    # VMEM sizing: double-buffered I/O (24*TN bytes) + h1/h2 temporaries
    # (2 * act_bytes * H * TN) + tiny weights.  Keep >=32 MiB, cap at 48 MiB for
    # headroom on v7x's 64 MiB physical VMEM.
    act_bytes = 2 if use_bf16_activations else 4
    need = (24 + 2 * act_bytes * h) * tile_n + 4 * (h * h + 5 * h + 8)
    vmem_limit = int(min(48 * 1024 * 1024, max(32 * 1024 * 1024, 2 * need)))

    # Advisory cost estimate so XLA schedules the transpose/pad/slice around the call.
    param_bytes = 4 * (h * 2 + h + h * h + h + h + 1)
    cost = pl.CostEstimate(
        flops=int((2 * h * h + 6 * h) * n_pad),
        transcendentals=int((2 * h + 1) * n_pad),
        bytes_accessed=int(12 * n_pad + param_bytes),
    )

    grid = (n_pad // tile_n,)
    const = lambda shape: pl.BlockSpec(shape, lambda i: (0, 0))  # VMEM-resident params

    kernel = functools.partial(_rawnet_kernel, act_dtype=act_dtype)

    out_t = pl.pallas_call(
        kernel,
        out_shape=jax.ShapeDtypeStruct((1, n_pad), jnp.float32),
        grid=grid,
        in_specs=[
            pl.BlockSpec((2, tile_n), lambda i: (0, i)),          # streamed input tile
            const((h, 2)),
            const((h, 1)),
            const((h, h)),
            const((h, 1)),
            const((h, 1)),
            pl.BlockSpec(memory_space=pltpu.MemorySpace.SMEM),    # b3 scalar on scalar path
        ],
        out_specs=pl.BlockSpec((1, tile_n), lambda i: (0, i)),    # lane-dense output
        compiler_params=pltpu.CompilerParams(
            dimension_semantics=("parallel",),   # megacore split of batch tiles (v7x)
            vmem_limit_bytes=vmem_limit,
        ),
        cost_estimate=cost,
    )(x_t, w1, b1, w2, b2, w3, b3)

    return out_t[:, :n].T.astype(x.dtype)  # [N, 1]


def init_params(num_hid, key):
    """Deterministic synthetic init matching nn.Linear shapes (PyTorch convention)."""
    ks = jax.random.split(key, 6)

    def u(k, shape, fan_in):
        bound = 1.0 / jnp.sqrt(fan_in)
        return jax.random.uniform(k, shape, jnp.float32, -bound, bound)

    return {
        "w1": u(ks[0], (num_hid, 2), 2),              # in_hidden1.weight
        "b1": u(ks[1], (num_hid,), 2),                # in_hidden1.bias
        "w2": u(ks[2], (num_hid, num_hid), num_hid),  # hidden1_hidden2.weight
        "b2": u(ks[3], (num_hid,), num_hid),          # hidden1_hidden2.bias
        "w3": u(ks[4], (1, num_hid), num_hid),        # hidden2_out.weight
        "b3": u(ks[5], (1,), num_hid),                # hidden2_out.bias
    }


def rawnet_reference(x, p):
    h1 = jnp.tanh(x @ p["w1"].T + p["b1"])
    h2 = jnp.tanh(h1 @ p["w2"].T + p["b2"])
    return jax.nn.sigmoid(h2 @ p["w3"].T + p["b3"])


if __name__ == "__main__":
    key = jax.random.PRNGKey(0)
    k_x, k_x2, k_p = jax.random.split(key, 3)

    num_hid = 32
    batch = 8
    x = jax.random.normal(k_x, (batch, 2), jnp.float32)
    params = init_params(num_hid, k_p)

    out = jax.block_until_ready(rawnet_forward(x, params))
    ref = rawnet_reference(x, params)
    assert out.shape == (batch, 1), out.shape
    assert jnp.allclose(out, ref, atol=1e-5, rtol=1e-5), (out, ref)

    # Second check: exercises multiple grid steps and a partial (padded) last tile
    # with the auto-picked tile size (>=4 tiles for this N).
    x2 = jax.random.normal(k_x2, (1000, 2), jnp.float32)
    out2 = jax.block_until_ready(rawnet_forward(x2, params))
    ref2 = rawnet_reference(x2, params)
    assert out2.shape == (1000, 1), out2.shape
    assert jnp.allclose(out2, ref2, atol=1e-5, rtol=1e-5)

    # Third check: explicit tile override still works (2 grid steps, uneven tail).
    out3 = jax.block_until_ready(rawnet_forward(x2, params, tile_n=512))
    assert jnp.allclose(out3, ref2, atol=1e-5, rtol=1e-5)

    print("KERNEL_OK")
</pallas_src>

<mosaic_0001>
module attributes {stable_mosaic.version = 11 : i64} {
  func.func @_rawnet_kernel(%arg0: i32, %arg1: memref<2x512xf32, #tpu.memory_space<vmem>>, %arg2: memref<32x2xf32, #tpu.memory_space<vmem>>, %arg3: memref<32x1xf32, #tpu.memory_space<vmem>>, %arg4: memref<32x32xf32, #tpu.memory_space<vmem>>, %arg5: memref<32x1xf32, #tpu.memory_space<vmem>>, %arg6: memref<32x1xf32, #tpu.memory_space<vmem>>, %arg7: memref<1xf32, #tpu.memory_space<smem>>, %arg8: memref<1x512xf32, #tpu.memory_space<vmem>>) attributes {dimension_semantics = [#tpu.dimension_semantics<parallel>], iteration_bounds = array<i64: 1>, scalar_prefetch = 0 : i64, scratch_operands = 0 : i64, tpu.core_type = #tpu.core_type<tc>, window_params = [{transform_indices = @transform_0, window_bounds = array<i64: 2, 512>}, {pipeline_mode = #tpu.pipeline_mode<synchronous>, transform_indices = @transform_1, window_bounds = array<i64: 32, 2>}, {pipeline_mode = #tpu.pipeline_mode<synchronous>, transform_indices = @transform_2, window_bounds = array<i64: 32, 1>}, {pipeline_mode = #tpu.pipeline_mode<synchronous>, transform_indices = @transform_3, window_bounds = array<i64: 32, 32>}, {pipeline_mode = #tpu.pipeline_mode<synchronous>, transform_indices = @transform_4, window_bounds = array<i64: 32, 1>}, {pipeline_mode = #tpu.pipeline_mode<synchronous>, transform_indices = @transform_5, window_bounds = array<i64: 32, 1>}, {transform_indices = @transform_6, window_bounds = array<i64: 1>}, {transform_indices = @transform_7, window_bounds = array<i64: 1, 512>}]} {
    %c0 = arith.constant 0 : index
    %c0_0 = arith.constant 0 : index
    %0 = vector.load %arg1[%c0, %c0_0] : memref<2x512xf32, #tpu.memory_space<vmem>>, vector<1x512xf32>
    %c1 = arith.constant 1 : index
    %c0_1 = arith.constant 0 : index
    %1 = vector.load %arg1[%c1, %c0_1] : memref<2x512xf32, #tpu.memory_space<vmem>>, vector<1x512xf32>
    %c0_2 = arith.constant 0 : index
    %c0_3 = arith.constant 0 : index
    %2 = vector.load %arg2[%c0_2, %c0_3] : memref<32x2xf32, #tpu.memory_space<vmem>>, vector<32x1xf32>
    %3 = vector.broadcast %2 : vector<32x1xf32> to vector<32x512xf32>
    %4 = vector.broadcast %0 : vector<1x512xf32> to vector<32x512xf32>
    %5 = arith.mulf %3, %4 : vector<32x512xf32>
    %c0_4 = arith.constant 0 : index
    %c1_5 = arith.constant 1 : index
    %6 = vector.load %arg2[%c0_4, %c1_5] : memref<32x2xf32, #tpu.memory_space<vmem>>, vector<32x1xf32>
    %7 = vector.broadcast %6 : vector<32x1xf32> to vector<32x512xf32>
    %8 = vector.broadcast %1 : vector<1x512xf32> to vector<32x512xf32>
    %9 = arith.mulf %7, %8 : vector<32x512xf32>
    %10 = arith.addf %5, %9 : vector<32x512xf32>
    %c0_6 = arith.constant 0 : index
    %c0_7 = arith.constant 0 : index
    %11 = vector.load %arg3[%c0_6, %c0_7] : memref<32x1xf32, #tpu.memory_space<vmem>>, vector<32x1xf32>
    %12 = vector.broadcast %11 : vector<32x1xf32> to vector<32x512xf32>
    %13 = arith.addf %10, %12 : vector<32x512xf32>
    %14 = math.tanh %13 : vector<32x512xf32>
    %c0_8 = arith.constant 0 : index
    %c0_9 = arith.constant 0 : index
    %15 = vector.load %arg4[%c0_8, %c0_9] : memref<32x32xf32, #tpu.memory_space<vmem>>, vector<32x32xf32>
    %cst = arith.constant dense<0.000000e+00> : vector<32x512xf32>
    %16 = tpu.matmul %15, %14, %cst {dimension_numbers = #tpu.dot_dimension_numbers<[1], [0], [0], [1], [0, 0, 1, 1], [], []>} : vector<32x32xf32>, vector<32x512xf32>, vector<32x512xf32> -> vector<32x512xf32>
    %c0_10 = arith.constant 0 : index
    %c0_11 = arith.constant 0 : index
    %17 = vector.load %arg5[%c0_10, %c0_11] : memref<32x1xf32, #tpu.memory_space<vmem>>, vector<32x1xf32>
    %18 = vector.broadcast %17 : vector<32x1xf32> to vector<32x512xf32>
    %19 = arith.addf %16, %18 : vector<32x512xf32>
    %20 = math.tanh %19 : vector<32x512xf32>
    %c0_12 = arith.constant 0 : index
    %c0_13 = arith.constant 0 : index
    %21 = vector.load %arg6[%c0_12, %c0_13] : memref<32x1xf32, #tpu.memory_space<vmem>>, vector<32x1xf32>
    %22 = vector.broadcast %21 : vector<32x1xf32> to vector<32x512xf32>
    %23 = arith.mulf %22, %20 : vector<32x512xf32>
    %cst_14 = arith.constant dense<0.000000e+00> : vector<512xf32>
    %24 = vector.multi_reduction <add>, %23, %cst_14 [0] : vector<32x512xf32> to vector<512xf32>
    %25 = vector.shape_cast %24 : vector<512xf32> to vector<1x512xf32>
    %c0_15 = arith.constant 0 : index
    %26 = memref.load %arg7[%c0_15] : memref<1xf32, #tpu.memory_space<smem>>
    %27 = vector.broadcast %26 : f32 to vector<1x512xf32>
    %28 = arith.addf %25, %27 : vector<1x512xf32>
    %29 = arith.negf %28 : vector<1x512xf32>
    %30 = math.exp %29 : vector<1x512xf32>
    %cst_16 = arith.constant 1.000000e+00 : f32
    %31 = vector.broadcast %cst_16 : f32 to vector<1x512xf32>
    %32 = arith.addf %31, %30 : vector<1x512xf32>
    %33 = arith.divf %31, %32 : vector<1x512xf32>
    %c0_17 = arith.constant 0 : index
    %c0_18 = arith.constant 0 : index
    %34 = vector.load %arg8[%c0_17, %c0_18] : memref<1x512xf32, #tpu.memory_space<vmem>>, vector<1x512xf32>
    tpu.vector_store %arg8[%c0_17, %c0_18], %33 {strides = array<i32>} : memref<1x512xf32, #tpu.memory_space<vmem>>, vector<1x512xf32>,
    return
  }
  func.func @transform_0(%arg0: i32) -> (i32, i32) {
    %c0_i32 = arith.constant 0 : i32
    %c0_i32_0 = arith.constant 0 : i32
    return %c0_i32, %arg0 : i32, i32
  }
  func.func @transform_1(%arg0: i32) -> (i32, i32) {
    %c0_i32 = arith.constant 0 : i32
    %c0_i32_0 = arith.constant 0 : i32
    %c0_i32_1 = arith.constant 0 : i32
    return %c0_i32, %c0_i32_0 : i32, i32
  }
  func.func @transform_2(%arg0: i32) -> (i32, i32) {
    %c0_i32 = arith.constant 0 : i32
    %c0_i32_0 = arith.constant 0 : i32
    %c0_i32_1 = arith.constant 0 : i32
    return %c0_i32, %c0_i32_0 : i32, i32
  }
  func.func @transform_3(%arg0: i32) -> (i32, i32) {
    %c0_i32 = arith.constant 0 : i32
    %c0_i32_0 = arith.constant 0 : i32
    %c0_i32_1 = arith.constant 0 : i32
    return %c0_i32, %c0_i32_0 : i32, i32
  }
  func.func @transform_4(%arg0: i32) -> (i32, i32) {
    %c0_i32 = arith.constant 0 : i32
    %c0_i32_0 = arith.constant 0 : i32
    %c0_i32_1 = arith.constant 0 : i32
    return %c0_i32, %c0_i32_0 : i32, i32
  }
  func.func @transform_5(%arg0: i32) -> (i32, i32) {
    %c0_i32 = arith.constant 0 : i32
    %c0_i32_0 = arith.constant 0 : i32
    %c0_i32_1 = arith.constant 0 : i32
    return %c0_i32, %c0_i32_0 : i32, i32
  }
  func.func @transform_6(%arg0: i32) -> i32 {
    %c0_i32 = arith.constant 0 : i32
    %c0_i32_0 = arith.constant 0 : i32
    return %c0_i32 : i32
  }
  func.func @transform_7(%arg0: i32) -> (i32, i32) {
    %c0_i32 = arith.constant 0 : i32
    %c0_i32_0 = arith.constant 0 : i32
    return %c0_i32, %arg0 : i32, i32
  }
}

</mosaic_0001>

<bundles_post_ra>
// kernel: tpu_custom_call.1
= control target key start
LH: loop header
LB: loop body
LE: loop exit
PB: predicated region body
PF: predicated region fallthrough
CT: control target
= control target key end

     0   :  { %v698_v3 = vmov 0   ;;  %s870_s0 = inlined_call_operand.vmem [shape: f32[2,512], index: 0, kind: input, shape index: {}]   ;;  %s871_s1 = inlined_call_operand.vmem [shape: f32[32,2], index: 1, kind: input, shape index: {}]   ;;  %s872_s2 = inlined_call_operand.vmem [shape: f32[32,1], index: 2, kind: input, shape index: {}]   ;;  %s873_s3 = inlined_call_operand.vmem [shape: f32[32,32], index: 3, kind: input, shape index: {}]   ;;  %s874_s4 = inlined_call_operand.vmem [shape: f32[32,1], index: 4, kind: input, shape index: {}]   ;;  %s875_s5 = inlined_call_operand.vmem [shape: f32[32,1], index: 5, kind: input, shape index: {}]   ;;  %s876_s6 = inlined_call_operand.<no memory space> [shape: f32[1], index: 6, kind: input, shape index: {}]   ;;  %s877_s7 = inlined_call_operand.hbm [shape: f32[1,512], index: 7, kind: output, shape index: {}]  }
   0x1   :  { %v34_v0 = vld [vmem:[%s871_s1 + $0x18] sm:$0xff]  ;;  %v33_v1 = vld [vmem:[%s871_s1 + $0x10] sm:$0xff]  ;;  %v32_v2 = vld [vmem:[%s871_s1 + $0x8] sm:$0xff]  ;;  %587 = vset.pattern.permute.xlu2 %v698_v3  ;;  %585 = vset.pattern.permute.xlu1 %v698_v3 }
   0x2   :  { %583 = vset.pattern.permute.xlu0 %v698_v3  ;;  %47 = vperm.xlu1 %585, %v33_v1  }
   0x3   :  { %52 = vperm.xlu0 %583, %v34_v0   ;;  %42 = vperm.xlu2 %587, %v32_v2  }
   0x4   :  { %13 = vsyncpa [#allocation4], 0  ;;  %v699_v4 = vmov 1   ;;  %v31_v5 = vld [vmem:[%s871_s1] sm:$0xff]  ;;  %v140_v6 = vld [vmem:[%s872_s2 + $0x18] sm:$0xff]  ;;  %vm221_vm0 = vcmask 261120  }
   0x5   :  { %v139_v7 = vld [vmem:[%s872_s2 + $0x10] sm:$0xff]  ;;  %v137_v8 = vld [vmem:[%s872_s2] sm:$0xff]  ;;  %v138_v9 = vld [vmem:[%s872_s2 + $0x8] sm:$0xff]  ;;  %vm531_vm5 = vcmask 1040384   ;;  %s550_s20 = sshll.u32 %s877_s7, 4  ;;  %s551_s20 = int_to_ptr.hbm [resolvable:$true] %s550_s20 }
   0x6   :  { %v197_v10 = vld [vmem:[%s874_s4] sm:$0xff]  ;;  %v198_v12 = vld [vmem:[%s874_s4 + $0x8] sm:$0xff]  ;;  %v199_v13 = vld [vmem:[%s874_s4 + $0x10] sm:$0xff] }
   0x7   :  { %v366_v11 = vld [vmem:[%s875_s5] sm:$0xff]  ;;  %v369_v14 = vld [vmem:[%s875_s5 + $0x18] sm:$0xff]  ;;  %v367_v16 = vld [vmem:[%s875_s5 + $0x8] sm:$0xff] }
   0x8   :  { %v200_v15 = vld [vmem:[%s874_s4 + $0x18] sm:$0xff]  ;;  %v368_v17 = vld [vmem:[%s875_s5 + $0x10] sm:$0xff]  ;;  %v559_v21 = vld [vmem:[%s870_s0 + $0x1] ss:$2 sm:$0xf] }
   0x9   :  { %v28_v23 = vld [vmem:[%s870_s0] ss:$2 sm:$0xf]  ;;  %v97_v24 = vperm.slane %v559_v21, 0  ;;  %v98_v25 = vperm.slane %v559_v21, 1  ;;  %v99_v35 = vperm.slane %v559_v21, 2 }
   0xa   :  { %586 = vset.pattern.permute.xlu1 %v699_v4  ;;  %v56_v27 = vperm.slane %v28_v23, 0  ;;  %v57_v28 = vperm.slane %v28_v23, 1  ;;  %v100_v36 = vperm.slane %v559_v21, 3  ;;  %v58_v37 = vperm.slane %v28_v23, 2 }
   0xb   :  { %584 = vset.pattern.permute.xlu0 %v699_v4  ;;  %588 = vset.pattern.permute.xlu2 %v699_v4  ;;  %v59_v39 = vperm.slane %v28_v23, 3 }
   0xc   :  { %93 = vperm.xlu0 %584, %v34_v0   ;;  %89 = vperm.xlu1 %586, %v33_v1  }
   0xd   :  { %85 = vperm.xlu2 %588, %v32_v2  }
  0x14   :  { %589 = vset.pattern.permute.xlu1 %v698_v3  ;;  %81 = vperm.xlu0 %584, %v31_v5  }
  0x15   :  { %590 = vset.pattern.permute.xlu2 %v698_v3  ;;  %158 = vperm.xlu1 %589, %v140_v6  }
  0x16   :  { %37 = vperm.xlu2 %590, %v31_v5  }
  0x1c   :  { %591 = vset.pattern.permute.xlu0 %v698_v3 }
  0x1d   :  { %153 = vperm.xlu1 %589, %v139_v7   ;;  %143 = vperm.xlu0 %591, %v137_v8  }
  0x1e   :  { %148 = vperm.xlu2 %590, %v138_v9  }
  0x25   :  { %203 = vperm.xlu1 %589, %v197_v10   ;;  %372 = vperm.xlu0 %591, %v366_v11  }
  0x26   :  { %208 = vperm.xlu2 %590, %v198_v12  }
  0x2d   :  { %213 = vperm.xlu1 %589, %v199_v13   ;;  %387 = vperm.xlu0 %591, %v369_v14  }
  0x2e   :  { %218 = vperm.xlu2 %590, %v200_v15  }
  0x35   :  { %377 = vperm.xlu1 %589, %v367_v16  }
  0x36   :  { %382 = vperm.xlu2 %590, %v368_v17  }
  0x5d   :  { %v43_v18 = vpop.permute.xlu2 %42 }
  0x5e   :  { %v68_v29 = vmul.f32 %v56_v27, %v43_v18  ;;  %v69_v31 = vmul.f32 %v57_v28, %v43_v18  ;;  %v70_v41 = vmul.f32 %v58_v37, %v43_v18  ;;  %v71_v45 = vmul.f32 %v59_v39, %v43_v18 }
  0x67   :  { %v86_v19 = vpop.permute.xlu2 %85 }
  0x68   :  { %v109_v30 = vmul.f32 %v97_v24, %v86_v19  ;;  %v110_v32 = vmul.f32 %v98_v25, %v86_v19  ;;  %v111_v46 = vmul.f32 %v99_v35, %v86_v19  ;;  %v112_v47 = vmul.f32 %v100_v36, %v86_v19 }
  0x6a   :  { %v125_v38 = vadd.f32 %v109_v30, %v68_v29  ;;  %v126_v40 = vadd.f32 %v110_v32, %v69_v31  ;;  %v127_v61 = vadd.f32 %v111_v46, %v70_v41  ;;  %v128_v62 = vadd.f32 %v112_v47, %v71_v45 }
  0x70   :  { %v797_v26 = vpop.permute.xlu2 %37 }
  0x71   :  { %v64_v60 = vmul.f32 %v56_v27, %v797_v26  ;;  %v65_v4 = vmul.f32 %v57_v28, %v797_v26  ;;  %v66_v5 = vmul.f32 %v58_v37, %v797_v26  ;;  %v67_v30 = vmul.f32 %v59_v39, %v797_v26 }
  0x74   :  { %v789_v20 = vpop.permute.xlu1 %47 }
  0x75   :  { %v53_v22 = vpop.permute.xlu0 %52  ;;  %v72_v10 = vmul.f32 %v56_v27, %v789_v20  ;;  %v73_v13 = vmul.f32 %v57_v28, %v789_v20  ;;  %v74_v14 = vmul.f32 %v58_v37, %v789_v20  ;;  %v75_v16 = vmul.f32 %v59_v39, %v789_v20 }
  0x76   :  { %v76_v51 = vmul.f32 %v56_v27, %v53_v22  ;;  %v77_v52 = vmul.f32 %v57_v28, %v53_v22  ;;  %v78_v53 = vmul.f32 %v58_v37, %v53_v22  ;;  %v79_v55 = vmul.f32 %v59_v39, %v53_v22 }
  0x78   :  { %v149_v48 = vpop.permute.xlu2 %148 }
  0x79   :  { %v165_v50 = vadd.f32 %v149_v48, %v125_v38  ;;  %v166_v54 = vadd.f32 %v149_v48, %v126_v40  ;;  %v167_v11 = vadd.f32 %v149_v48, %v127_v61  ;;  %v168_v17 = vadd.f32 %v149_v48, %v128_v62 }
  0x7b   :  { %592 = vtanh.f32 %v165_v50 }
  0x7c   :  { %594 = vtanh.f32 %v166_v54 }
  0x7e   :  { %v94_v33 = vpop.permute.xlu0 %93  ;;  %v90_v34 = vpop.permute.xlu1 %89 }
  0x7f   :  { %v117_v42 = vmul.f32 %v97_v24, %v94_v33  ;;  %v118_v43 = vmul.f32 %v98_v25, %v94_v33  ;;  %v119_v44 = vmul.f32 %v99_v35, %v94_v33  ;;  %v120_v49 = vmul.f32 %v100_v36, %v94_v33 }
  0x80   :  { %v113_v7 = vmul.f32 %v97_v24, %v90_v34  ;;  %v114_v8 = vmul.f32 %v98_v25, %v90_v34  ;;  %v115_v9 = vmul.f32 %v99_v35, %v90_v34  ;;  %v116_v12 = vmul.f32 %v100_v36, %v90_v34 }
  0x81   :  { %v133_v57 = vadd.f32 %v117_v42, %v76_v51  ;;  %v134_v58 = vadd.f32 %v118_v43, %v77_v52  ;;  %v135_v59 = vadd.f32 %v119_v44, %v78_v53  ;;  %v136_v0 = vadd.f32 %v120_v49, %v79_v55  ;;  %v593_v19 = vpop.eup %592  ;;  %v193_v53 = vld [vmem:[%s873_s3] sm:$0xff] }
  0x82   :  { %v129_v22 = vadd.f32 %v113_v7, %v72_v10  ;;  %v130_v23 = vadd.f32 %v114_v8, %v73_v13  ;;  %v131_v29 = vadd.f32 %v115_v9, %v74_v14  ;;  %v595_v27 = vpop.eup %594  ;;  %v132_v32 = vadd.f32 %v116_v12, %v75_v16 }
  0x86   :  { %v82_v56 = vpop.permute.xlu0 %81 }
  0x87   :  { %v159_v63 = vpop.permute.xlu1 %158  ;;  %v105_v15 = vmul.f32 %v97_v24, %v82_v56  ;;  %v106_v18 = vmul.f32 %v98_v25, %v82_v56  ;;  %v107_v21 = vmul.f32 %v99_v35, %v82_v56  ;;  %v108_v31 = vmul.f32 %v100_v36, %v82_v56 }
  0x88   :  { %v173_v1 = vadd.f32 %v159_v63, %v133_v57  ;;  %v174_v2 = vadd.f32 %v159_v63, %v134_v58  ;;  %v175_v3 = vadd.f32 %v159_v63, %v135_v59  ;;  %v176_v6 = vadd.f32 %v159_v63, %v136_v0  ;;  %v194_v57 = vld [vmem:[%s873_s3 + $0x8] sm:$0xff]  ;;  %v195_v58 = vld [vmem:[%s873_s3 + $0x10] sm:$0xff]  ;;  %v196_v59 = vld [vmem:[%s873_s3 + $0x18] sm:$0xff] }
  0x89   :  { %v121_v38 = vadd.f32 %v105_v15, %v64_v60  ;;  %v122_v35 = vadd.f32 %v106_v18, %v65_v4  ;;  %v123_v42 = vadd.f32 %v107_v21, %v66_v5  ;;  %v124_v36 = vadd.f32 %v108_v31, %v67_v30 }
  0x8a   :  { %596 = vtanh.f32 %v173_v1 }
  0x8b   :  { %598 = vtanh.f32 %v174_v2 }
  0x8c   :  { %600 = vtanh.f32 %v175_v3  ;;  %v209_v3 = vpop.permute.xlu2 %208 }
  0x8d   :  { %602 = vtanh.f32 %v176_v6 }
  0x8e   :  { %604 = vtanh.f32 %v167_v11 }
  0x8f   :  { %v154_v28 = vpop.permute.xlu1 %153  ;;  %v144_v33 = vpop.permute.xlu0 %143  ;;  %606 = vtanh.f32 %v168_v17 }
  0x90   :  { %v597_v24 = vpop.eup %596  ;;  %v169_v34 = vadd.f32 %v154_v28, %v129_v22  ;;  %v170_v37 = vadd.f32 %v154_v28, %v130_v23  ;;  %v171_v20 = vadd.f32 %v154_v28, %v131_v29  ;;  %v172_v40 = vadd.f32 %v154_v28, %v132_v32 }
  0x91   :  { %v599_v25 = vpop.eup %598  ;;  %246 = vmatpush.msra.mxu0 %v597_v24  ;;  %v161_v43 = vadd.f32 %v144_v33, %v121_v38  ;;  %v162_v39 = vadd.f32 %v144_v33, %v122_v35  ;;  %v163_v44 = vadd.f32 %v144_v33, %v123_v42  ;;  %v164_v46 = vadd.f32 %v144_v33, %v124_v36 }
  0x92   :  { %v601_v41 = vpop.eup %600  ;;  %608 = vtanh.f32 %v169_v34  ;;  %275 = vmatpush.msra.mxu1 %v599_v25 }
  0x93   :  { %v603_v26 = vpop.eup %602  ;;  %610 = vtanh.f32 %v170_v37  ;;  %304 = vmatpush.msra.mxu2 %v601_v41 }
  0x94   :  { %612 = vtanh.f32 %v171_v20  ;;  %333 = vmatpush.msra.mxu3 %v603_v26  ;;  %v605_v45 = vpop.eup %604  ;;  %v219_v17 = vpop.permute.xlu2 %218 }
  0x95   :  { %614 = vtanh.f32 %v172_v40  ;;  %v607_v47 = vpop.eup %606 }
  0x96   :  { %616 = vtanh.f32 %v161_v43 }
  0x97   :  { %618 = vtanh.f32 %v162_v39  ;;  %v204_v62 = vpop.permute.xlu1 %203  ;;  %v373_v22 = vpop.permute.xlu0 %372 }
  0x98   :  { %v609_v48 = vpop.eup %608  ;;  %620 = vtanh.f32 %v163_v44 }
  0x99   :  { %v611_v49 = vpop.eup %610  ;;  %622 = vtanh.f32 %v164_v46  ;;  %247 = vmatpush.msra.mxu0 %v609_v48 }
  0x9a   :  { %v613_v50 = vpop.eup %612  ;;  %276 = vmatpush.msra.mxu1 %v611_v49 }
  0x9b   :  { %v615_v51 = vpop.eup %614  ;;  %305 = vmatpush.msra.mxu2 %v613_v50  ;;  %248 = vmatpush.msra.mxu0 %v593_v19 }
  0x9c   :  { %v617_v52 = vpop.eup %616  ;;  %334 = vmatpush.msra.mxu3 %v615_v51  ;;  %277 = vmatpush.msra.mxu1 %v595_v27  ;;  %v383_v43 = vpop.permute.xlu2 %382 }
  0x9d   :  { %v619_v54 = vpop.eup %618  ;;  %306 = vmatpush.msra.mxu2 %v605_v45  ;;  %249 = vmatpush.msra.mxu0 %v617_v52 }
  0x9e   :  { %v621_v55 = vpop.eup %620  ;;  %335 = vmatpush.msra.mxu3 %v607_v47  ;;  %278 = vmatpush.msra.mxu1 %v619_v54 }
  0x9f   :  { %v623_v56 = vpop.eup %622  ;;  %307 = vmatpush.msra.mxu2 %v621_v55  ;;  %560 = vmatmul.msk.f32.vlgmr.msra.gmra.mxu0 %vm221_vm0, %v193_v53  ;;  %v214_v13 = vpop.permute.xlu1 %213 }
  0xa0   :  { %336 = vmatpush.msra.mxu3 %v623_v56  ;;  %564 = vmatmul.msk.f32.vlgmr.msra.gmra.mxu1 %vm221_vm0, %v193_v53  ;;  %v388_v55 = vpop.permute.xlu0 %387 }
  0xa1   :  { %568 = vmatmul.msk.f32.vlgmr.msra.gmra.mxu2 %vm221_vm0, %v193_v53  ;;  %572 = vmatmul.msk.f32.vlgmr.msra.gmra.mxu3 %vm221_vm0, %v193_v53 }
  0xa7   :  { %561 = vmatmul.msk.f32.gmra.mxu0 %vm221_vm0, %v194_v57  ;;  %v378_v40 = vpop.permute.xlu1 %377 }
  0xa8   :  { %565 = vmatmul.msk.f32.gmra.mxu1 %vm221_vm0, %v194_v57 }
  0xa9   :  { %569 = vmatmul.msk.f32.gmra.mxu2 %vm221_vm0, %v194_v57  ;;  %573 = vmatmul.msk.f32.gmra.mxu3 %vm221_vm0, %v194_v57 }
  0xaf   :  { %562 = vmatmul.msk.f32.gmra.mxu0 %vm221_vm0, %v195_v58 }
  0xb0   :  { %566 = vmatmul.msk.f32.gmra.mxu1 %vm221_vm0, %v195_v58 }
  0xb1   :  { %570 = vmatmul.msk.f32.gmra.mxu2 %vm221_vm0, %v195_v58  ;;  %574 = vmatmul.msk.f32.gmra.mxu3 %vm221_vm0, %v195_v58 }
  0xb7   :  { %563 = vmatmul.msk.f32.gmra.mxu0 %vm221_vm0, %v196_v59 }
  0xb8   :  { %567 = vmatmul.msk.f32.gmra.mxu1 %vm221_vm0, %v196_v59 }
  0xb9   :  { %571 = vmatmul.msk.f32.gmra.mxu2 %vm221_vm0, %v196_v59  ;;  %575 = vmatmul.msk.f32.gmra.mxu3 %vm221_vm0, %v196_v59 }
 0x11c   :  { %v251_v60 = vpop.f32.mrf.mxu0 }
 0x11d   :  { %v280_v61 = vpop.f32.mrf.mxu1  ;;  %v252_v4 = vadd.f32 %v251_v60, %v204_v62 }
 0x11e   :  { %v281_v5 = vadd.f32 %v280_v61, %v204_v62 }
 0x11f   :  { %624 = vtanh.f32 %v252_v4 }
 0x120   :  { %626 = vtanh.f32 %v281_v5 }
 0x124   :  { %v309_v63 = vpop.f32.mrf.mxu2  ;;  %v338_v0 = vpop.f32.mrf.mxu3 }
 0x125   :  { %v254_v1 = vpop.f32.mrf.mxu0  ;;  %v283_v2 = vpop.f32.mrf.mxu1  ;;  %v310_v6 = vadd.f32 %v309_v63, %v204_v62  ;;  %v339_v7 = vadd.f32 %v338_v0, %v204_v62 }
 0x126   :  { %v255_v10 = vadd.f32 %v254_v1, %v209_v3  ;;  %v284_v14 = vadd.f32 %v283_v2, %v209_v3  ;;  %v625_v21 = vpop.eup %624 }
 0x127   :  { %628 = vtanh.f32 %v310_v6  ;;  %v627_v23 = vpop.eup %626  ;;  %v390_v39 = vmul.f32 %v625_v21, %v373_v22 }
 0x128   :  { %630 = vtanh.f32 %v339_v7  ;;  %v391_v48 = vmul.f32 %v627_v23, %v373_v22 }
 0x129   :  { %632 = vtanh.f32 %v255_v10 }
 0x12a   :  { %634 = vtanh.f32 %v284_v14 }
 0x12c   :  { %v312_v8 = vpop.f32.mrf.mxu2  ;;  %v341_v9 = vpop.f32.mrf.mxu3 }
 0x12d   :  { %v257_v11 = vpop.f32.mrf.mxu0  ;;  %v286_v12 = vpop.f32.mrf.mxu1  ;;  %v313_v18 = vadd.f32 %v312_v8, %v209_v3  ;;  %v342_v19 = vadd.f32 %v341_v9, %v209_v3 }
 0x12e   :  { %v258_v15 = vadd.f32 %v257_v11, %v214_v13  ;;  %v287_v16 = vadd.f32 %v286_v12, %v214_v13  ;;  %v629_v30 = vpop.eup %628 }
 0x12f   :  { %v631_v24 = vpop.eup %630  ;;  %v392_v0 = vmul.f32 %v629_v30, %v373_v22 }
 0x130   :  { %636 = vtanh.f32 %v258_v15  ;;  %v633_v20 = vpop.eup %632  ;;  %v393_v3 = vmul.f32 %v631_v24, %v373_v22 }
 0x131   :  { %638 = vtanh.f32 %v287_v16  ;;  %v635_v38 = vpop.eup %634  ;;  %v394_v41 = vmul.f32 %v633_v20, %v378_v40 }
 0x132   :  { %640 = vtanh.f32 %v313_v18  ;;  %v395_v26 = vmul.f32 %v635_v38, %v378_v40 }
 0x133   :  { %642 = vtanh.f32 %v342_v19  ;;  %v406_v53 = vadd.f32 %v394_v41, %v390_v39 }
 0x134   :  { %v315_v29 = vpop.f32.mrf.mxu2  ;;  %v344_v27 = vpop.f32.mrf.mxu3  ;;  %v415_v56 = vadd.f32 %v395_v26, %v391_v48 }
 0x135   :  { %v316_v31 = vadd.f32 %v315_v29, %v214_v13  ;;  %v345_v28 = vadd.f32 %v344_v27, %v214_v13  ;;  %v260_v32 = vpop.f32.mrf.mxu0  ;;  %v289_v33 = vpop.f32.mrf.mxu1 }
 0x136   :  { %v261_v34 = vadd.f32 %v260_v32, %v219_v17  ;;  %v290_v37 = vadd.f32 %v289_v33, %v219_v17  ;;  %v637_v25 = vpop.eup %636  ;;  %v443_v32 = vstv %s876_s6  ;;  %s700_s6 = smov [#allocation3]  }
 0x137   :  { %644 = vtanh.f32 %v316_v31  ;;  %v639_v35 = vpop.eup %638  ;;  %v398_v44 = vmul.f32 %v637_v25, %v383_v43  ;;  %s548_s17 = sshll.u32 %s700_s6, 4  ;;  %s549_s17 = int_to_ptr.vmem [resolvable:$true] %s548_s17 }
 0x138   :  { %646 = vtanh.f32 %v345_v28  ;;  %v641_v42 = vpop.eup %640  ;;  %v399_v49 = vmul.f32 %v639_v35, %v383_v43 }
 0x139   :  { %648 = vtanh.f32 %v261_v34  ;;  %v643_v36 = vpop.eup %642  ;;  %v396_v58 = vmul.f32 %v641_v42, %v378_v40  ;;  %v407_v59 = vadd.f32 %v406_v53, %v398_v44 }
 0x13a   :  { %650 = vtanh.f32 %v290_v37  ;;  %v397_v61 = vmul.f32 %v643_v36, %v378_v40  ;;  %v416_v62 = vadd.f32 %v415_v56, %v399_v49 }
 0x13b   :  { %v424_v6 = vadd.f32 %v396_v58, %v392_v0 }
 0x13c   :  { %v318_v45 = vpop.f32.mrf.mxu2  ;;  %v347_v46 = vpop.f32.mrf.mxu3  ;;  %v433_v9 = vadd.f32 %v397_v61, %v393_v3 }
 0x13d   :  { %v645_v47 = vpop.eup %644  ;;  %v319_v50 = vadd.f32 %v318_v45, %v219_v17  ;;  %v348_v51 = vadd.f32 %v347_v46, %v219_v17 }
 0x13e   :  { %v647_v52 = vpop.eup %646  ;;  %v400_v1 = vmul.f32 %v645_v47, %v383_v43 }
 0x13f   :  { %v649_v54 = vpop.eup %648  ;;  %652 = vtanh.f32 %v319_v50  ;;  %v401_v4 = vmul.f32 %v647_v52, %v383_v43 }
 0x140   :  { %v651_v57 = vpop.eup %650  ;;  %v402_v60 = vmul.f32 %v649_v54, %v388_v55  ;;  %654 = vtanh.f32 %v348_v51  ;;  %v425_v12 = vadd.f32 %v424_v6, %v400_v1 }
 0x141   :  { %v403_v63 = vmul.f32 %v651_v57, %v388_v55  ;;  %v434_v15 = vadd.f32 %v433_v9, %v401_v4  ;;  %v538_v4 = vlaneseq }
 0x142   :  { %v408_v2 = vadd.f32 %v407_v59, %v402_v60 }
 0x143   :  { %v417_v5 = vadd.f32 %v416_v62, %v403_v63 }
 0x144   :  { %v409_v7 = vrot.slane %v408_v2, 4 }
 0x145   :  { %v653_v8 = vpop.eup %652  ;;  %v418_v10 = vrot.slane %v417_v5, 4 }
 0x146   :  { %v655_v11 = vpop.eup %654  ;;  %v410_v13 = vadd.f32 %v409_v7, %v408_v2  ;;  %v404_v14 = vmul.f32 %v653_v8, %v388_v55 }
 0x147   :  { %v419_v16 = vadd.f32 %v418_v10, %v417_v5  ;;  %v405_v17 = vmul.f32 %v655_v11, %v388_v55 }
 0x148   :  { %v411_v18 = vrot.slane %v410_v13, 2  ;;  %v426_v19 = vadd.f32 %v425_v12, %v404_v14 }
 0x149   :  { %v420_v21 = vrot.slane %v419_v16, 2  ;;  %v435_v23 = vadd.f32 %v434_v15, %v405_v17 }
 0x14a   :  { %v412_v29 = vadd.f32 %v411_v18, %v410_v13  ;;  %v427_v22 = vrot.slane %v426_v19, 4 }
 0x14b   :  { %v421_v27 = vadd.f32 %v420_v21, %v419_v16  ;;  %v436_v30 = vrot.slane %v435_v23, 4 }
 0x14c   :  { %v413_v31 = vrot.slane %v412_v29, 1  ;;  %v428_v28 = vadd.f32 %v427_v22, %v426_v19 }
 0x14d   :  { %v422_v33 = vrot.slane %v421_v27, 1  ;;  %v437_v24 = vadd.f32 %v436_v30, %v435_v23 }
 0x14e   :  { %v414_v34 = vadd.f32 %v413_v31, %v412_v29  ;;  %v429_v37 = vrot.slane %v428_v28, 2 }
 0x14f   :  { %v423_v20 = vadd.f32 %v422_v33, %v421_v27  ;;  %v438_v38 = vrot.slane %v437_v24, 2 }
 0x150   :  { %v444_v25 = vadd.f32 %v443_v32, %v414_v34  ;;  %v430_v40 = vadd.f32 %v429_v37, %v428_v28 }
 0x151   :  { %v445_v35 = vadd.f32 %v443_v32, %v423_v20  ;;  %v439_v41 = vadd.f32 %v438_v38, %v437_v24 }
 0x152   :  { %v576_v42 = vmul.f32 -1.442695, %v444_v25  ;;  %v431_v43 = vrot.slane %v430_v40, 1 }
 0x153   :  { %v577_v26 = vmul.f32 -1.442695, %v445_v35  ;;  %v440_v36 = vrot.slane %v439_v41, 1 }
 0x154   :  { %656 = vpow2.f32 %v576_v42  ;;  %v432_v39 = vadd.f32 %v431_v43, %v430_v40 }
 0x155   :  { %658 = vpow2.f32 %v577_v26  ;;  %v441_v44 = vadd.f32 %v440_v36, %v439_v41 }
 0x156   :  { %v446_v45 = vadd.f32 %v443_v32, %v432_v39 }
 0x157   :  { %v447_v46 = vadd.f32 %v443_v32, %v441_v44 }
 0x158   :  { %v578_v47 = vmul.f32 -1.442695, %v446_v45 }
 0x159   :  { %v579_v48 = vmul.f32 -1.442695, %v447_v46 }
 0x15a   :  { %v657_v49 = vpop.eup %656  ;;  %660 = vpow2.f32 %v578_v47 }
 0x15b   :  { %v659_v50 = vpop.eup %658  ;;  %v838_v51 = vadd.f32 1.0, %v657_v49  ;;  %662 = vpow2.f32 %v579_v48 }
 0x15c   :  { %v461_v52 = vadd.f32 1.0, %v659_v50 }
 0x15d   :  { %664 = vrcp.f32 %v838_v51  ;;  %vm469_vm3 = vweird.f32 %v838_v51  ;;  %v475_v29 = vand.u32 2147483648, %v838_v51  ;;  %v473_v30 = vand.u32 2147483647, %v838_v51 }
 0x15e   :  { %666 = vrcp.f32 %v461_v52  ;;  %v490_v63 = vand.u32 2147483648, %v461_v52  ;;  %vm484_vm2 = vweird.f32 %v461_v52  ;;  %v488_v7 = vand.u32 2147483647, %v461_v52 }
 0x15f   :  { %v476_v38 = vor.u32 1.1754944e-38, %v475_v29 }
 0x160   :  { %v661_v53 = vpop.eup %660  ;;  %v491_v10 = vor.u32 1.1754944e-38, %v490_v63  ;;  %vm489_vm8 = vcmp.eq.f32.partialorder %v488_v7, 8.507059e+37 }
 0x161   :  { %v663_v54 = vpop.eup %662  ;;  %v462_v55 = vadd.f32 1.0, %v661_v53 }
 0x162   :  { %v463_v56 = vadd.f32 1.0, %v663_v54 }
 0x163   :  { %v841_v57 = vpop.eup %664  ;;  %668 = vrcp.f32 %v462_v55  ;;  %v503_v12 = vand.u32 2147483647, %v462_v55  ;;  %v505_v14 = vand.u32 2147483648, %v462_v55  ;;  %vm499_vm11 = vweird.f32 %v462_v55 }
 0x164   :  { %v667_v58 = vpop.eup %666  ;;  %670 = vrcp.f32 %v463_v56  ;;  %v465_v59 = vmul.f32 %v841_v57, %v838_v51  ;;  %vm470_vm6 = vweird.f32 %v841_v57  ;;  %v518_v17 = vand.u32 2147483647, %v463_v56 }
 0x165   :  { %v480_v60 = vmul.f32 %v667_v58, %v461_v52  ;;  %vm485_vm1 = vweird.f32 %v667_v58  ;;  %v520_v18 = vand.u32 2147483648, %v463_v56  ;;  %vm857_vm10 = vmor %vm469_vm3, %vm470_vm6  ;;  %v506_v31 = vor.u32 1.1754944e-38, %v505_v14 }
 0x166   :  { %v466_v61 = vsub.f32 1.0, %v465_v59  ;;  %vm847_vm4 = vmor %vm484_vm2, %vm485_vm1  ;;  %vm514_vm13 = vweird.f32 %v463_v56  ;;  %vm504_vm14 = vcmp.eq.f32.partialorder %v503_v12, 8.507059e+37  ;;  %vm519_vm0 = vcmp.eq.f32.partialorder %v518_v17, 8.507059e+37 }
 0x167   :  { %v481_v62 = vsub.f32 1.0, %v480_v60  ;;  %v521_v33 = vor.u32 1.1754944e-38, %v520_v18  ;;  %vm533_vm1 = vcmask 1042434   ;;  %vm474_vm2 = vcmp.eq.f32.partialorder %v473_v30, 8.507059e+37 }
 0x168   :  { %v467_v5 = vmul.f32 %v841_v57, %v466_v61  ;;  %vm535_vm3 = vcmask 1041408  }
 0x169   :  { %v669_v0 = vpop.eup %668  ;;  %v482_v1 = vmul.f32 %v667_v58, %v481_v62 }
 0x16a   :  { %v671_v2 = vpop.eup %670  ;;  %v495_v3 = vmul.f32 %v669_v0, %v462_v55  ;;  %vm500_vm7 = vweird.f32 %v669_v0  ;;  %v468_v19 = vadd.f32 %v841_v57, %v467_v5 }
 0x16b   :  { %v483_v6 = vadd.f32 %v667_v58, %v482_v1  ;;  %v510_v8 = vmul.f32 %v671_v2, %v463_v56  ;;  %vm515_vm9 = vweird.f32 %v671_v2  ;;  %vm501_vm12 = vmor %vm499_vm11, %vm500_vm7 }
 0x16c   :  { %v496_v11 = vsub.f32 1.0, %v495_v3  ;;  %vm516_vm15 = vmor %vm514_vm13, %vm515_vm9  ;;  %v472_v24 = vsel %vm857_vm10, %v841_v57, %v468_v19 }
 0x16d   :  { %v487_v13 = vsel %vm847_vm4, %v667_v58, %v483_v6  ;;  %v511_v15 = vsub.f32 1.0, %v510_v8  ;;  %v477_v41 = vsel %vm474_vm2, %v476_v38, %v472_v24  ;;  %vm540_vm4 = vcmp.lt.s32.totalorder %v538_v4, 512 }
 0x16e   :  { %v497_v16 = vmul.f32 %v669_v0, %v496_v11  ;;  %v492_v22 = vsel %vm489_vm8, %v491_v10, %v487_v13 }
 0x16f   :  { %v512_v21 = vmul.f32 %v671_v2, %v511_v15  ;;  %v528_v20 = vrot.slane %v492_v22, 7 }
 0x170   :  { %v498_v27 = vadd.f32 %v669_v0, %v497_v16 }
 0x171   :  { %v513_v28 = vadd.f32 %v671_v2, %v512_v21  ;;  %v532_v42 = vsel %vm531_vm5, %v477_v41, %v528_v20 }
 0x172   :  { %v502_v32 = vsel %vm501_vm12, %v669_v0, %v498_v27 }
 0x173   :  { %v507_v34 = vsel %vm504_vm14, %v506_v31, %v502_v32  ;;  %v517_v37 = vsel %vm516_vm15, %v671_v2, %v513_v28 }
 0x174   :  { %v522_v25 = vsel %vm519_vm0, %v521_v33, %v517_v37  ;;  %v529_v40 = vrot.slane %v507_v34, 6 }
 0x175   :  { %v530_v35 = vrot.slane %v522_v25, 5 }
 0x177   :  { %v534_v43 = vsel %vm533_vm1, %v529_v40, %v530_v35 }
 0x178   :  { %v536_v26 = vsel %vm535_vm3, %v532_v42, %v534_v43 }
 0x179   :  { %542 = vst.msk [vmem:[#allocation3] sm:$0xf] %vm540_vm4, %v536_v26 }
 0x17a   :  { %553 = dma.vmem_to_hbm [thread:$0]  %s549_s17, 64, %s551_s20, [#allocation4]  }
 0x17b   :  { %696 = dma.done.wait [#allocation4], 64  }
 0x17c   :  { %697 = vsyncadd [#allocation4], 4294967232 }
 0x17d   :  { %558 = vsyncpa [#allocation4], 1 }

</bundles_post_ra>
